<compile_context>
chip_gen: v5e
topology: v5e:2x2
jax: 0.10.0
libtpu: 0.0.40
codegen_flags: <defaults>
</compile_context>

<pallas_src>
import functools

import jax
import jax.numpy as jnp
from jax.experimental import pallas as pl
from jax.experimental.pallas import tpu as pltpu

LANES = 128
TILE_R_MAX = 1024   # rows per grid step (multiple of 32 => safe for f32/bf16/i8)
NUM_CORES = 2       # leading "parallel" grid axis (v7x megacore; loop on v5e/v6e)


def _round_up(x, m):
    return ((x + m - 1) // m) * m


def _dice_partial_kernel(p_ref, t_ref, inter_ref, denom_ref,
                         inter_acc, denom_acc, *,
                         rows_total, tile_r, blocks_per_core, need_mask):
    c = pl.program_id(0)   # core split ("parallel")
    j = pl.program_id(1)   # row-tile stream ("arbitrary")

    @pl.when(j == 0)
    def _():
        inter_acc[...] = jnp.zeros_like(inter_acc)
        denom_acc[...] = jnp.zeros_like(denom_acc)

    p = p_ref[...].astype(jnp.float32)
    t = t_ref[...].astype(jnp.float32)

    if need_mask:
        # Logical (unclamped) block index -> global row ids; rows past the
        # real array (partial tail block / clamped OOB blocks) contribute 0.
        block_idx = c * blocks_per_core + j
        row_ids = block_idx * tile_r + jax.lax.broadcasted_iota(
            jnp.int32, (tile_r, LANES), 0)
        valid = row_ids < rows_total
        p = jnp.where(valid, p, 0.0)
        t = jnp.where(valid, t, 0.0)

    # Wide VPU adds into vreg-shaped accumulators; no cross-lane reduce here.
    inter_acc[...] += jnp.sum((p * t).reshape(-1, 8, LANES), axis=0)
    denom_acc[...] += jnp.sum((p + t).reshape(-1, 8, LANES), axis=0)

    @pl.when(j == pl.num_programs(1) - 1)
    def _():
        inter_ref[...] = inter_acc[...][None]
        denom_ref[...] = denom_acc[...][None]


def dice(prediction, target, smooth=1.0):
    """Matches Dice.forward: scalar f32 dice coefficient over flattened inputs."""
    smooth = float(smooth)
    p_flat = jnp.ravel(prediction)
    t_flat = jnp.ravel(target)
    n = p_flat.shape[0]
    assert t_flat.shape[0] == n, "prediction and target must have equal numel"
    if n == 0:
        # (0 + smooth) / (0 + smooth)
        return jnp.float32(1.0)

    # Only pad (full copy) in the rare case numel is not lane-aligned.
    if n % LANES != 0:
        pad = LANES - (n % LANES)
        p_flat = jnp.pad(p_flat, (0, pad))
        t_flat = jnp.pad(t_flat, (0, pad))
    rows = p_flat.shape[0] // LANES
    p2 = p_flat.reshape(rows, LANES)
    t2 = t_flat.reshape(rows, LANES)

    tile_r = min(TILE_R_MAX, _round_up(rows, 32))
    num_blocks = pl.cdiv(rows, tile_r)
    bpc = pl.cdiv(num_blocks, NUM_CORES)            # blocks per core
    need_mask = (NUM_CORES * bpc * tile_r != rows)  # ragged tail / OOB blocks

    def in_map(c, j):
        # Clamp so the DMA source block always lies inside the array; the
        # in-kernel mask zeroes any logically-OOB rows.
        return (jnp.minimum(c * bpc + j, num_blocks - 1), 0)

    kernel = functools.partial(
        _dice_partial_kernel,
        rows_total=rows, tile_r=tile_r, blocks_per_core=bpc, need_mask=need_mask)

    inter_out, denom_out = pl.pallas_call(
        kernel,
        out_shape=(
            jax.ShapeDtypeStruct((NUM_CORES, 8, LANES), jnp.float32),
            jax.ShapeDtypeStruct((NUM_CORES, 8, LANES), jnp.float32),
        ),
        grid_spec=pltpu.PrefetchScalarGridSpec(
            num_scalar_prefetch=0,
            grid=(NUM_CORES, bpc),
            in_specs=[
                pl.BlockSpec((tile_r, LANES), in_map),
                pl.BlockSpec((tile_r, LANES), in_map),
            ],
            out_specs=[
                pl.BlockSpec((1, 8, LANES), lambda c, j: (c, 0, 0)),
                pl.BlockSpec((1, 8, LANES), lambda c, j: (c, 0, 0)),
            ],
            scratch_shapes=[
                pltpu.VMEM((8, LANES), jnp.float32),
                pltpu.VMEM((8, LANES), jnp.float32),
            ],
        ),
        compiler_params=pltpu.CompilerParams(
            dimension_semantics=("parallel", "arbitrary"),
        ),
    )(p2, t2)

    intersection = jnp.sum(inter_out)
    denom = jnp.sum(denom_out)
    return (2.0 * intersection + smooth) / (denom + smooth)


if __name__ == "__main__":
    key = jax.random.PRNGKey(0)
    kp, kt = jax.random.split(key)
    # Segmentation-style NCHW input: [2, 4, 16, 16]
    prediction = jax.random.uniform(kp, (2, 4, 16, 16), dtype=jnp.float32)
    target = (jax.random.uniform(kt, (2, 4, 16, 16)) > 0.5).astype(jnp.float32)

    result = dice(prediction, target, smooth=1.0)
    result = jax.block_until_ready(result)

    # Pure-JAX reference check
    p = prediction.reshape(-1)
    t = target.reshape(-1)
    ref = (2.0 * jnp.sum(p * t) + 1.0) / (jnp.sum(p) + jnp.sum(t) + 1.0)
    assert jnp.allclose(result, ref, rtol=1e-5, atol=1e-6), (result, ref)

    print("KERNEL_OK")
</pallas_src>

<mosaic_0001>
module attributes {stable_mosaic.version = 11 : i64} {
  func.func @_dice_partial_kernel(%arg0: i32, %arg1: i32, %arg2: memref<32x128xf32, #tpu.memory_space<vmem>>, %arg3: memref<32x128xf32, #tpu.memory_space<vmem>>, %arg4: memref<1x8x128xf32, #tpu.memory_space<vmem>>, %arg5: memref<1x8x128xf32, #tpu.memory_space<vmem>>, %arg6: memref<8x128xf32, #tpu.memory_space<vmem>>, %arg7: memref<8x128xf32, #tpu.memory_space<vmem>>) attributes {dimension_semantics = [#tpu.dimension_semantics<parallel>, #tpu.dimension_semantics<arbitrary>], iteration_bounds = array<i64: 2, 1>, scalar_prefetch = 0 : i64, scratch_operands = 2 : i64, tpu.core_type = #tpu.core_type<tc>, window_params = [{transform_indices = @transform_0, window_bounds = array<i64: 32, 128>}, {transform_indices = @transform_1, window_bounds = array<i64: 32, 128>}, {transform_indices = @transform_2, window_bounds = array<i64: 1, 8, 128>}, {transform_indices = @transform_3, window_bounds = array<i64: 1, 8, 128>}]} {
    %c0_i32 = arith.constant 0 : i32
    %0 = arith.cmpi eq, %arg1, %c0_i32 : i32
    %1 = arith.extui %0 : i1 to i32
    %c0_i32_0 = arith.constant 0 : i32
    %2 = arith.cmpi ne, %1, %c0_i32_0 : i32
    scf.if %2 {
      %cst_17 = arith.constant 0.000000e+00 : f32
      %32 = vector.broadcast %cst_17 : f32 to vector<8x128xf32>
      %c0_18 = arith.constant 0 : index
      %c0_19 = arith.constant 0 : index
      %33 = vector.load %arg6[%c0_18, %c0_19] : memref<8x128xf32, #tpu.memory_space<vmem>>, vector<8x128xf32>
      tpu.vector_store %arg6[%c0_18, %c0_19], %32 {strides = array<i32>} : memref<8x128xf32, #tpu.memory_space<vmem>>, vector<8x128xf32>,
      %cst_20 = arith.constant 0.000000e+00 : f32
      %34 = vector.broadcast %cst_20 : f32 to vector<8x128xf32>
      %c0_21 = arith.constant 0 : index
      %c0_22 = arith.constant 0 : index
      %35 = vector.load %arg7[%c0_21, %c0_22] : memref<8x128xf32, #tpu.memory_space<vmem>>, vector<8x128xf32>
      tpu.vector_store %arg7[%c0_21, %c0_22], %34 {strides = array<i32>} : memref<8x128xf32, #tpu.memory_space<vmem>>, vector<8x128xf32>,
    } else {
    }
    %c0 = arith.constant 0 : index
    %c0_1 = arith.constant 0 : index
    %3 = vector.load %arg2[%c0, %c0_1] : memref<32x128xf32, #tpu.memory_space<vmem>>, vector<32x128xf32>
    %c0_2 = arith.constant 0 : index
    %c0_3 = arith.constant 0 : index
    %4 = vector.load %arg3[%c0_2, %c0_3] : memref<32x128xf32, #tpu.memory_space<vmem>>, vector<32x128xf32>
    %c1_i32 = arith.constant 1 : i32
    %5 = arith.muli %arg0, %c1_i32 : i32
    %6 = arith.addi %5, %arg1 : i32
    %c32_i32 = arith.constant 32 : i32
    %7 = arith.muli %6, %c32_i32 : i32
    %8 = tpu.iota {dimensions = array<i32: 0>} : vector<32x128xi32>
    %9 = vector.broadcast %7 : i32 to vector<32x128xi32>
    %10 = arith.addi %9, %8 : vector<32x128xi32>
    %c16_i32 = arith.constant 16 : i32
    %11 = vector.broadcast %c16_i32 : i32 to vector<32x128xi32>
    %12 = arith.cmpi slt, %10, %11 : vector<32x128xi32>
    %cst = arith.constant 0.000000e+00 : f32
    %13 = vector.broadcast %cst : f32 to vector<32x128xf32>
    %14 = arith.select %12, %3, %13 : vector<32x128xi1>, vector<32x128xf32>
    %cst_4 = arith.constant 0.000000e+00 : f32
    %15 = vector.broadcast %cst_4 : f32 to vector<32x128xf32>
    %16 = arith.select %12, %4, %15 : vector<32x128xi1>, vector<32x128xf32>
    %c0_5 = arith.constant 0 : index
    %c0_6 = arith.constant 0 : index
    %17 = vector.load %arg6[%c0_5, %c0_6] : memref<8x128xf32, #tpu.memory_space<vmem>>, vector<8x128xf32>
    %18 = arith.mulf %14, %16 : vector<32x128xf32>
    %19 = vector.shape_cast %18 : vector<32x128xf32> to vector<4x8x128xf32>
    %cst_7 = arith.constant dense<0.000000e+00> : vector<8x128xf32>
    %20 = vector.multi_reduction <add>, %19, %cst_7 [0] : vector<4x8x128xf32> to vector<8x128xf32>
    %21 = arith.addf %17, %20 : vector<8x128xf32>
    %c0_8 = arith.constant 0 : index
    %c0_9 = arith.constant 0 : index
    %22 = vector.load %arg6[%c0_8, %c0_9] : memref<8x128xf32, #tpu.memory_space<vmem>>, vector<8x128xf32>
    tpu.vector_store %arg6[%c0_8, %c0_9], %21 {strides = array<i32>} : memref<8x128xf32, #tpu.memory_space<vmem>>, vector<8x128xf32>,
    %c0_10 = arith.constant 0 : index
    %c0_11 = arith.constant 0 : index
    %23 = vector.load %arg7[%c0_10, %c0_11] : memref<8x128xf32, #tpu.memory_space<vmem>>, vector<8x128xf32>
    %24 = arith.addf %14, %16 : vector<32x128xf32>
    %25 = vector.shape_cast %24 : vector<32x128xf32> to vector<4x8x128xf32>
    %cst_12 = arith.constant dense<0.000000e+00> : vector<8x128xf32>
    %26 = vector.multi_reduction <add>, %25, %cst_12 [0] : vector<4x8x128xf32> to vector<8x128xf32>
    %27 = arith.addf %23, %26 : vector<8x128xf32>
    %c0_13 = arith.constant 0 : index
    %c0_14 = arith.constant 0 : index
    %28 = vector.load %arg7[%c0_13, %c0_14] : memref<8x128xf32, #tpu.memory_space<vmem>>, vector<8x128xf32>
    tpu.vector_store %arg7[%c0_13, %c0_14], %27 {strides = array<i32>} : memref<8x128xf32, #tpu.memory_space<vmem>>, vector<8x128xf32>,
    %c0_i32_15 = arith.constant 0 : i32
    %29 = arith.cmpi eq, %arg1, %c0_i32_15 : i32
    %30 = arith.extui %29 : i1 to i32
    %c0_i32_16 = arith.constant 0 : i32
    %31 = arith.cmpi ne, %30, %c0_i32_16 : i32
    scf.if %31 {
      %c0_17 = arith.constant 0 : index
      %c0_18 = arith.constant 0 : index
      %32 = vector.load %arg6[%c0_17, %c0_18] : memref<8x128xf32, #tpu.memory_space<vmem>>, vector<8x128xf32>
      %33 = vector.shape_cast %32 : vector<8x128xf32> to vector<1x8x128xf32>
      %c0_19 = arith.constant 0 : index
      %c0_20 = arith.constant 0 : index
      %c0_21 = arith.constant 0 : index
      %34 = vector.load %arg4[%c0_19, %c0_20, %c0_21] : memref<1x8x128xf32, #tpu.memory_space<vmem>>, vector<1x8x128xf32>
      tpu.vector_store %arg4[%c0_19, %c0_20, %c0_21], %33 {strides = array<i32>} : memref<1x8x128xf32, #tpu.memory_space<vmem>>, vector<1x8x128xf32>,
      %c0_22 = arith.constant 0 : index
      %c0_23 = arith.constant 0 : index
      %35 = vector.load %arg7[%c0_22, %c0_23] : memref<8x128xf32, #tpu.memory_space<vmem>>, vector<8x128xf32>
      %36 = vector.shape_cast %35 : vector<8x128xf32> to vector<1x8x128xf32>
      %c0_24 = arith.constant 0 : index
      %c0_25 = arith.constant 0 : index
      %c0_26 = arith.constant 0 : index
      %37 = vector.load %arg5[%c0_24, %c0_25, %c0_26] : memref<1x8x128xf32, #tpu.memory_space<vmem>>, vector<1x8x128xf32>
      tpu.vector_store %arg5[%c0_24, %c0_25, %c0_26], %36 {strides = array<i32>} : memref<1x8x128xf32, #tpu.memory_space<vmem>>, vector<1x8x128xf32>,
    } else {
    }
    return
  }
  func.func @transform_0(%arg0: i32, %arg1: i32) -> (i32, i32) {
    %c1_i32 = arith.constant 1 : i32
    %0 = arith.muli %arg0, %c1_i32 : i32
    %1 = arith.addi %0, %arg1 : i32
    %c0_i32 = arith.constant 0 : i32
    %2 = arith.minsi %1, %c0_i32 : i32
    %c0_i32_0 = arith.constant 0 : i32
    %c0_i32_1 = arith.constant 0 : i32
    return %2, %c0_i32_0 : i32, i32
  }
  func.func @transform_1(%arg0: i32, %arg1: i32) -> (i32, i32) {
    %c1_i32 = arith.constant 1 : i32
    %0 = arith.muli %arg0, %c1_i32 : i32
    %1 = arith.addi %0, %arg1 : i32
    %c0_i32 = arith.constant 0 : i32
    %2 = arith.minsi %1, %c0_i32 : i32
    %c0_i32_0 = arith.constant 0 : i32
    %c0_i32_1 = arith.constant 0 : i32
    return %2, %c0_i32_0 : i32, i32
  }
  func.func @transform_2(%arg0: i32, %arg1: i32) -> (i32, i32, i32) {
    %c0_i32 = arith.constant 0 : i32
    %c0_i32_0 = arith.constant 0 : i32
    %c0_i32_1 = arith.constant 0 : i32
    return %arg0, %c0_i32, %c0_i32_0 : i32, i32, i32
  }
  func.func @transform_3(%arg0: i32, %arg1: i32) -> (i32, i32, i32) {
    %c0_i32 = arith.constant 0 : i32
    %c0_i32_0 = arith.constant 0 : i32
    %c0_i32_1 = arith.constant 0 : i32
    return %arg0, %c0_i32, %c0_i32_0 : i32, i32, i32
  }
}

</mosaic_0001>

<bundles_post_ra>
// kernel: tpu_custom_call.1
= control target key start
LH: loop header
LB: loop body
LE: loop exit
PB: predicated region body
PF: predicated region fallthrough
CT: control target
= control target key end

     0   :  { %9 = vsyncpa [#allocation5], 0  ;;  %s1078_s0 = inlined_call_operand.hbm [shape: f32[16,128], index: 0, kind: input, shape index: {}]   ;;  %s1079_s1 = inlined_call_operand.hbm [shape: f32[16,128], index: 1, kind: input, shape index: {}]   ;;  %s1080_s2 = inlined_call_operand.hbm [shape: f32[2,8,128], index: 2, kind: output, shape index: {0}]   ;;  %s1081_s3 = inlined_call_operand.hbm [shape: f32[2,8,128], index: 3, kind: output, shape index: {1}]  }
   0x1   :  { %11 = vsyncpa [#allocation5 + $0x1], 0 }
   0x2   :  { %12 = vsyncpa [#allocation8], 0 }
   0x3   :  { %14 = vsyncpa [#allocation8 + $0x1], 0 }
   0x4   :  { %15 = vsyncpa [#allocation6], 0 }
   0x5   :  { %17 = vsyncpa [#allocation6 + $0x1], 0 }
   0x6   :  { %18 = vsyncpa [#allocation11], 0 }
   0x7   :  { %20 = vsyncpa [#allocation11 + $0x1], 0  ;;  %s901_s12 = smov 0   ;;  %s903_s13 = smov 0  }
   0x8   :  { %s905_s14 = smov 0   ;;  %s907_s15 = smov 0  }
   0x9   :  { %s909_s16 = smov 0   ;;  %s911_s17 = smov 0  }
   0xa   :  { %s913_s18 = smov 0   ;;  %s915_s19 = smov 0  }
   0xb LB: > { %s530_s20 = sadd.s32 4294967295, %s873_s19   ;;  %s531_s21 = sadd.s32 4294967294, %s873_s19   ;;  %s873_s19 = sphi %s915_s19, %s26_s19   ;;  %s869_s18 = sphi %s913_s18, %s1091_s18   ;;  %s865_s17 = sphi %s911_s17, %s1090_s17   ;;  %s861_s16 = sphi %s909_s16, %s1068_s16   ;;  %s857_s15 = sphi %s907_s15, %s1089_s15   ;;  %s853_s14 = sphi %s905_s14, %s1088_s14   ;;  %s849_s13 = sphi %s903_s13, %s1087_s13   ;;  %s845_s12 = sphi %s901_s12, %s1086_s12  }
   0xc   : > { %s38_s22 = sadd.s32 1, %s869_s18  ;;  %p842_p1 = scmp.ne.s32.totalorder %s861_s16, 0 }
   0xd   : > { %p40_p0 = scmp.ge.s32.totalorder %s38_s22, 2  ;;  %p59_p2 = scmp.eq.s32.totalorder %s873_s19, 0 }
   0xe   : > { %p64_p3 = scmp.ne.s32.totalorder %s861_s16, %s857_s15  ;;  %p65_p5 = scmp.eq.s32.totalorder %s530_s20, 0 }
   0xf   : > { %s1093_s22 = smov (%p40_p0, %s38_s22), 0  ;;  %p947_p4 = por %p842_p1, %p59_p2 }
  0x10   : > { %p951_p6 = por %p65_p5, %p64_p3  ;;  %s106_s25 = ssub.s32 %s869_s18, %s1093_s22 }
  0x11   : > { %p107_p7 = scmp.eq.s32.totalorder %s106_s25, 0  ;;  %s109_s26 = sadd.s32 1, %s853_s14 }
  0x12   : > { %p119_p8 = scmp.ne.s32.totalorder %s853_s14, %s849_s13  ;;  %p120_p9 = scmp.eq.s32.totalorder %s530_s20, 1 }
  0x13   : > { %s959_s27 = scalar_select %p107_p7, %s853_s14, %s109_s26  }
  0x14   : > { %p125_p10 = scmp.ne.s32.totalorder %s849_s13, %s845_s12  ;;  %p126_p11 = scmp.eq.s32.totalorder %s531_s21, 1 }
  0x15   : > { %p965_p12 = por %p120_p9, %p119_p8  ;;  %p533_p0 = scmp.ge.s32.totalorder %s873_s19, 2 }
  0x16   : > { %p969_p13 = por %p126_p11, %p125_p10 }
  0x17   : > { %168 = sbr.rel (%p533_p0) target bundleno = 72 (0x48), region = 16 }
  0x1c   : > { %171 = sbr.rel (!%p947_p4) target bundleno = 50 (0x32), region = 20 }
  0x21   : > { %185 = vsyncadd [#allocation5], 256  ;;  %s875_s30 = smov [#allocation4]   ;;  %s190_s7 = sshll.u32 %s1078_s0, 4  ;;  %s191_s7 = int_to_ptr.hbm [resolvable:$true] %s190_s7 }
  0x22   : > { %s192_s4 = sshll.u32 %s875_s30, 4  ;;  %s652_s8 = sshra.s32 %s191_s7, 4  ;;  %s193_s4 = int_to_ptr.vmem [resolvable:$true] %s192_s4  ;;  %s653_s8 = int_to_ptr.hbm [resolvable:$true] %s652_s8 }
  0x23   : > { %s659_s9 = scalar_lea.hbm %s653_s8, 16  ;;  %s663_s15 = scalar_lea.hbm %s1078_s0, 16 }
  0x24   : > { %p660_p1 = scmp.ne.s32.totalorder %s653_s8, %s659_s9  ;;  %p665_p2 = scmp.lt.s32.totalorder %s663_s15, %s659_s9 }
  0x26   : > { %p667_p3 = pnand %p665_p2, %p660_p1 }
  0x28   : > { %670 = shalt.err (!%p667_p3)
}
  0x29   : > { %s671_s20 = sshra.s32 %s193_s4, 4  ;;  %s682_s25 = scalar_lea.vmem %s875_s30, 64  ;;  %s672_s20 = int_to_ptr.vmem [resolvable:$true] %s671_s20 }
  0x2a   : > { %s678_s21 = scalar_lea.vmem %s672_s20, 16 }
  0x2b   : > { %p679_p5 = scmp.ne.s32.totalorder %s672_s20, %s678_s21  ;;  %p684_p7 = scmp.lt.s32.totalorder %s682_s25, %s678_s21 }
  0x2d   : > { %p686_p8 = pnand %p684_p7, %p679_p5 }
  0x2f   : > { %689 = shalt.err (!%p686_p8)
}
  0x30   : > { %s876_s26 = smov 128   ;;  %s877_s5 = smov 8  }
  0x31   : > { %198 = dma.hbm_to_vmem [thread:$0]  %s191_s7, 256, %s193_s4, [#allocation5], %s876_s26, %s876_s26, %s877_s5  }
  0x32 PF: > { %201 = sbr.rel (!%p947_p4) target bundleno = 72 (0x48), region = 24 }
  0x37   : > { %215 = vsyncadd [#allocation8], 256  ;;  %s878_s6 = smov [#allocation7]   ;;  %s220_s11 = sshll.u32 %s1079_s1, 4  ;;  %s221_s11 = int_to_ptr.hbm [resolvable:$true] %s220_s11 }
  0x38   : > { %s222_s8 = sshll.u32 %s878_s6, 4  ;;  %s691_s30 = sshra.s32 %s221_s11, 4  ;;  %s223_s8 = int_to_ptr.vmem [resolvable:$true] %s222_s8  ;;  %s692_s30 = int_to_ptr.hbm [resolvable:$true] %s691_s30 }
  0x39   : > { %s698_s15 = scalar_lea.hbm %s692_s30, 16  ;;  %s702_s4 = scalar_lea.hbm %s1079_s1, 16 }
  0x3a   : > { %p699_p9 = scmp.ne.s32.totalorder %s692_s30, %s698_s15  ;;  %p704_p10 = scmp.lt.s32.totalorder %s702_s4, %s698_s15 }
  0x3c   : > { %p706_p11 = pnand %p704_p10, %p699_p9 }
  0x3e   : > { %709 = shalt.err (!%p706_p11)
}
  0x3f   : > { %s710_s23 = sshra.s32 %s223_s8, 4  ;;  %s721_s25 = scalar_lea.vmem %s878_s6, 64  ;;  %s711_s23 = int_to_ptr.vmem [resolvable:$true] %s710_s23 }
  0x40   : > { %s717_s7 = scalar_lea.vmem %s711_s23, 16 }
  0x41   : > { %p718_p4 = scmp.ne.s32.totalorder %s711_s23, %s717_s7  ;;  %p723_p1 = scmp.lt.s32.totalorder %s721_s25, %s717_s7 }
  0x43   : > { %p725_p2 = pnand %p723_p1, %p718_p4 }
  0x45   : > { %728 = shalt.err (!%p725_p2)
}
  0x46   : > { %s879_s26 = smov 128   ;;  %s880_s5 = smov 8  }
  0x47   : > { %228 = dma.hbm_to_vmem [thread:$0]  %s221_s11, 256, %s223_s8, [#allocation8], %s879_s26, %s879_s26, %s880_s5  }
  0x48 PF: > { %p548_p3 = scmp.ge.s32.totalorder %s873_s19, 1  ;;  %p230_p5 = scmp.lt.s32.totalorder %s873_s19, 3 }
  0x4a   : > { %p231_p7 = pnand %p548_p3, %p230_p5 }
  0x4b   : > { %s236_s9 = sand.u32 (!%p231_p7), 1, %s861_s16  }
  0x4c   : > { %234 = sbr.rel (%p231_p7) target bundleno = 118 (0x76), region = 28  ;;  %s549_s10 = sshll.u32 (!%p231_p7), %s236_s9, 5 }
  0x4d   : > { %s237_s30 = scalar_lea.sflag (!%p231_p7), [#allocation5], %s236_s9  ;;  %s240_s6 = scalar_lea.vmem (!%p231_p7), [#allocation4], %s549_s10 }
  0x51   : > { %823 = dma.done.wait (%p951_p6), %s237_s30, 512  }
  0x52   : > { %825 = vsyncadd (%p951_p6), %s237_s30, 4294966784  ;;  %s247_s8 = scalar_lea.sflag [#allocation8], %s236_s9  ;;  %s250_s11 = scalar_lea.vmem [#allocation7], %s549_s10 }
  0x53   : > { %827 = dma.done.wait (%p951_p6), %s247_s8, 512  }
  0x54   : > { %829 = vsyncadd (%p951_p6), %s247_s8, 4294966784  ;;  %s553_s15 = sshll.u32 %s865_s17, 5  ;;  %v312_v0 = vlaneseq  ;;  %s1005_s20 = sand.u32 1, %s849_s13   ;;  %v302_v10 = vld [vmem:[%s240_s6] sm:$0xff]  ;;  %v303_v11 = vld [vmem:[%s240_s6 + $0x8] sm:$0xff] }
  0x55   : > { %v317_v1 = vstv %s553_s15  ;;  %s551_s24 = sshll.u32 %s1005_s20, 3  ;;  %v304_v12 = vld [vmem:[%s240_s6 + $0x10] sm:$0xff]  ;;  %s556_s21 = sshll.u32 %s865_s17, 3  ;;  %v305_v13 = vld [vmem:[%s240_s6 + $0x18] sm:$0xff]  ;;  %v306_v14 = vld [vmem:[%s250_s11] sm:$0xff] }
  0x56   : > { %v313_v2 = vshrl.u32 %v312_v0, 7  ;;  %v307_v15 = vld [vmem:[%s250_s11 + $0x8] sm:$0xff]  ;;  %v308_v16 = vld [vmem:[%s250_s11 + $0x10] sm:$0xff]  ;;  %v309_v17 = vld [vmem:[%s250_s11 + $0x18] sm:$0xff]  ;;  %s377_s23 = scalar_lea.hbm %s1080_s2, %s556_s21  ;;  %s391_s26 = scalar_lea.hbm %s1081_s3, %s556_s21 }
  0x57   : > { %s276_s5 = scalar_lea.vmem [#allocation9], %s551_s24  ;;  %s283_s10 = scalar_lea.vmem [#allocation10], %s551_s24 }
  0x58   : > { %v314_v3 = vadd.s32 8, %v313_v2  ;;  %v315_v4 = vadd.s32 16, %v313_v2  ;;  %v316_v5 = vadd.s32 24, %v313_v2  ;;  %v318_v6 = vadd.s32 %v317_v1, %v313_v2  ;;  %s379_s9 = sshll.u32 %s276_s5, 4  ;;  %s393_s30 = sshll.u32 %s283_s10, 4  ;;  %s380_s9 = int_to_ptr.vmem [resolvable:$true] %s379_s9  ;;  %s1021_s30 = int_to_ptr.vmem [resolvable:$true] %s393_s30 }
  0x59   : > { %s381_s6 = sshll.u32 %s377_s23, 4  ;;  %s395_s8 = sshll.u32 %s391_s26, 4  ;;  %s382_s6 = int_to_ptr.hbm [resolvable:$true] %s381_s6  ;;  %s1023_s8 = int_to_ptr.hbm [resolvable:$true] %s395_s8 }
  0x5a   : > { %v319_v7 = vadd.s32 %v317_v1, %v314_v3  ;;  %v320_v8 = vadd.s32 %v317_v1, %v315_v4  ;;  %v321_v9 = vadd.s32 %v317_v1, %v316_v5  ;;  %vm322_vm0 = vcmp.lt.s32.totalorder %v318_v6, 16  ;;  %s362_s11 = scalar_lea.sflag [#allocation6], %s1005_s20  ;;  %s744_s15 = sshra.s32 %s382_s6, 4  ;;  %s745_s15 = int_to_ptr.hbm [resolvable:$true] %s744_s15 }
  0x5b   : > { %v326_v18 = vsel %vm322_vm0, %v302_v10, 0.0  ;;  %v330_v22 = vsel %vm322_vm0, %v306_v14, 0.0  ;;  %s746_s24 = scalar_lea.hbm %s745_s15, 8  ;;  %s750_s4 = scalar_lea.hbm %s1080_s2, 16 }
  0x5c   : > { %vm323_vm1 = vcmp.lt.s32.totalorder %v319_v7, 16  ;;  %vm324_vm2 = vcmp.lt.s32.totalorder %v320_v8, 16  ;;  %vm325_vm3 = vcmp.lt.s32.totalorder %v321_v9, 16  ;;  %v335_v26 = vmul.f32 %v330_v22, %v326_v18  ;;  %p747_p6 = scmp.ne.s32.totalorder %s745_s15, %s746_s24  ;;  %p751_p10 = scmp.lt.s32.totalorder %s745_s15, %s1080_s2 }
  0x5d   : > { %v327_v19 = vsel %vm323_vm1, %v303_v11, 0.0  ;;  %v328_v20 = vsel %vm324_vm2, %v304_v12, 0.0  ;;  %v329_v21 = vsel %vm325_vm3, %v305_v13, 0.0  ;;  %v331_v23 = vsel %vm323_vm1, %v307_v15, 0.0  ;;  %p752_p11 = scmp.lt.s32.totalorder %s750_s4, %s746_s24 }
  0x5e   : > { %v332_v24 = vsel %vm324_vm2, %v308_v16, 0.0  ;;  %v333_v25 = vsel %vm325_vm3, %v309_v17, 0.0  ;;  %v336_v27 = vmul.f32 %v331_v23, %v327_v19  ;;  %v345_v29 = vadd.f32 %v330_v22, %v326_v18  ;;  %p748_p8 = pnand %p747_p6, %p965_p12 }
  0x5f   : > { %v337_v28 = vmul.f32 %v332_v24, %v328_v20  ;;  %v346_v30 = vadd.f32 %v331_v23, %v327_v19  ;;  %v347_v31 = vadd.f32 %v332_v24, %v328_v20  ;;  %v338_v32 = vmul.f32 %v333_v25, %v329_v21  ;;  %p753_p4 = por %p752_p11, %p751_p10 }
  0x60   : > { %v339_v33 = vadd.f32 %v336_v27, %v335_v26  ;;  %v348_v34 = vadd.f32 %v333_v25, %v329_v21  ;;  %p749_p9 = pneg %p748_p8 }
  0x61   : > { %v349_v35 = vadd.f32 %v346_v30, %v345_v29 }
  0x62   : > { %v340_v36 = vadd.f32 %v339_v33, %v337_v28  ;;  %p754_p1 = pnand %p753_p4, %p749_p9 }
  0x63   : > { %v350_v37 = vadd.f32 %v349_v35, %v347_v31 }
  0x64   : > { %v341_v38 = vadd.f32 %v340_v36, %v338_v32 }
  0x65   : > { %v351_v39 = vadd.f32 %v350_v37, %v348_v34 }
  0x66   : > { %358 = vst [vmem:[%s276_s5] sm:$0xff] %v341_v38 }
  0x67   : > { %360 = vst [vmem:[%s283_s10] sm:$0xff] %v351_v39 }
  0x68   : > { %757 = shalt.err (!%p754_p1)
}
  0x69   : > { %564 = dma.vmem_to_hbm [thread:$0]  (%p965_p12), %s380_s9, 128, %s382_s6, %s362_s11  }
  0x6a   : > { %s367_s25 = scalar_lea.sflag [#allocation11], %s1005_s20  ;;  %s772_s26 = sshra.s32 %s1023_s8, 4  ;;  %s773_s26 = int_to_ptr.hbm [resolvable:$true] %s772_s26 }
  0x6b   : > { %s774_s5 = scalar_lea.hbm %s773_s26, 8  ;;  %s778_s24 = scalar_lea.hbm %s1081_s3, 16 }
  0x6c   : > { %p775_p2 = scmp.ne.s32.totalorder %s773_s26, %s774_s5  ;;  %p779_p7 = scmp.lt.s32.totalorder %s773_s26, %s1081_s3 }
  0x6d   : > { %p780_p6 = scmp.lt.s32.totalorder %s778_s24, %s774_s5 }
  0x6e   : > { %p776_p3 = pnand %p775_p2, %p965_p12 }
  0x6f   : > { %p781_p8 = por %p780_p6, %p779_p7 }
  0x70   : > { %p777_p5 = pneg %p776_p3 }
  0x72   : > { %p782_p9 = pnand %p781_p8, %p777_p5 }
  0x74   : > { %785 = shalt.err (!%p782_p9)
}
  0x75   : > { %565 = dma.vmem_to_hbm [thread:$0]  (%p965_p12), %s1021_s30, 128, %s1023_s8, %s367_s25  }
  0x76 PF: > { %s407_s20 = sand.u32 1, %s845_s12   ;;  %p569_p10 = pnand %p533_p0, %p969_p13 }
  0x77   : > { %s408_s9 = scalar_lea.sflag [#allocation6], %s407_s20 }
  0x78   : > { %p570_p11 = pneg %p569_p10 }
  0x7a   : > { %831 = dma.done.wait (%p570_p11), %s408_s9, 128  }
  0x7b   : > { %833 = vsyncadd (%p570_p11), %s408_s9, 4294967168  ;;  %s418_s6 = scalar_lea.sflag [#allocation11], %s407_s20 }
  0x7c   : > { %835 = dma.done.wait (%p570_p11), %s418_s6, 128  }
  0x7d   : > { %837 = vsyncadd (%p570_p11), %s418_s6, 4294967168  ;;  %s26_s19 = sadd.s32 1, %s873_s19   ;;  %s1086_s12 = smov %s849_s13 }
  0x7e   : > { %p23_p4 = scmp.ge.s32.totalorder %s26_s19, 4   ;;  %s1087_s13 = smov %s853_s14 }
  0x7f   : > { %s1088_s14 = smov %s959_s27  ;;  %s1089_s15 = smov %s861_s16 }
  0x80   : > { %s1068_s16 = smov 0   ;;  %s1090_s17 = smov %s869_s18 }
  0x81   : > { %s1091_s18 = smov %s1093_s22  ;;  %25 = sbr.rel (!%p23_p4) target bundleno = 11 (0xb), region = 111 }
  0x86   :  { %424 = vsyncpa [#allocation5], 1 }
  0x87   :  { %426 = vsyncpa [#allocation5 + $0x1], 1 }
  0x88   :  { %427 = vsyncpa [#allocation8], 1 }
  0x89   :  { %429 = vsyncpa [#allocation8 + $0x1], 1 }
  0x8a   :  { %430 = vsyncpa [#allocation6], 1 }
  0x8b   :  { %432 = vsyncpa [#allocation6 + $0x1], 1 }
  0x8c   :  { %433 = vsyncpa [#allocation11], 1 }
  0x8d   :  { %435 = vsyncpa [#allocation11 + $0x1], 1 }

</bundles_post_ra>
